<compile_context>
chip_gen: v5e
topology: v5e:2x2
jax: 0.10.0
libtpu: 0.0.40
codegen_flags: <defaults>
</compile_context>

<pallas_src>
import math

import jax
import jax.numpy as jnp
from jax.experimental import pallas as pl
from jax.experimental.pallas import tpu as pltpu


def _round_up(x, m):
    return (x + m - 1) // m * m


def _linear_add_relu_kernel(bmat_ref, bias_ref, x1_ref, x2_ref, o_ref):
    """Packed-layout fused linear + add + relu (dense x2 stream).

    bmat_ref: (P*K, 128) f32, grid-resident  -- kron(I_P, w).
    bias_ref: (1, 128)   f32, grid-resident  -- tile(b, P).
    x1_ref:   (rt, P*K)  tile -- packed view of x1 rows (lane-dense).
    x2_ref:   (rt, 128)  tile -- packed view of x2 rows (lane-dense).
    o_ref:    (rt, 128)  tile -- packed view of the output (unmasked stores).
    """
    a = x1_ref[...].astype(jnp.float32)
    o1 = jnp.dot(a, bmat_ref[...], preferred_element_type=jnp.float32)
    acc = o1 + bias_ref[...] + x2_ref[...].astype(jnp.float32)
    o_ref[...] = jnp.maximum(acc, 0.0).astype(o_ref.dtype)


def _linear_relu_kernel(bmat_ref, bias_ref, x1_ref, o_ref):
    """Same as above but x2 was fully broadcast and is already folded into bias."""
    a = x1_ref[...].astype(jnp.float32)
    o1 = jnp.dot(a, bmat_ref[...], preferred_element_type=jnp.float32)
    o_ref[...] = jnp.maximum(o1 + bias_ref[...], 0.0).astype(o_ref.dtype)


def linear_add_relu(x1, x2, w, b, *, block_rows=4096):
    """relu(x1 @ w + b + x2).

    x1: (..., K); w: (K, N); b: (N,); x2 broadcastable against (..., N).
    Requires 128 % N == 0 (true for this module's N = 8).
    `block_rows` = packed 128-lane rows per grid step (16 logical rows each).
    """
    x1 = jnp.asarray(x1)
    x2 = jnp.asarray(x2)
    w = jnp.asarray(w)
    b = jnp.asarray(b)

    *lead, K = x1.shape
    Kw, N = w.shape
    assert K == Kw and 128 % N == 0, (K, Kw, N)
    P = 128 // N                              # logical rows per packed lane-row
    M = math.prod(lead) if lead else 1
    # Match PyTorch-style type promotion instead of forcing x1.dtype.
    out_dtype = jnp.result_type(x1.dtype, w.dtype, b.dtype, x2.dtype)

    # ---- tiny constant operands (grid-resident VMEM tiles) ------------------
    # kron(I_P, w): (P*K, 128).  Multiplying the packed x1 view by it performs
    # the per-row K->N contraction directly in the packed lane layout.
    bmat = jnp.kron(jnp.eye(P, dtype=jnp.float32), w.astype(jnp.float32))
    bias_row = jnp.tile(b.astype(jnp.float32), P).reshape(1, P * N)

    # Fold a fully row-broadcast x2 (e.g. (1, 1, N), (N,), scalar) into bias.
    fold_x2 = all(int(d) == 1 for d in x2.shape[:-1])
    if fold_x2:
        x2_row = jnp.broadcast_to(x2.astype(jnp.float32),
                                  x2.shape[:-1] + (N,)).reshape(N)
        bias_row = bias_row + jnp.tile(x2_row, P).reshape(1, P * N)

    # ---- packed (lane-dense) views of the streaming operands ----------------
    x1_2d = x1.reshape(M, K)
    Mp = _round_up(M, P)
    if Mp != M:
        # TODO(synk): mask the ragged tail in-kernel instead of this pad copy
        # (only triggers when M is not a multiple of 16).
        x1_2d = jnp.pad(x1_2d, ((0, Mp - M), (0, 0)))
    Rp = Mp // P
    x1p = x1_2d.reshape(Rp, P * K)            # free reshape (contiguous)

    x2p = None
    if not fold_x2:
        # TODO(synk): a partially-broadcast x2 (e.g. (B, 1, N)) still gets
        # materialized to (M, N) here; fold it per-row in-kernel instead.
        x2_2d = jnp.broadcast_to(x2, (*lead, N)).reshape(M, N)
        if Mp != M:
            x2_2d = jnp.pad(x2_2d, ((0, Mp - M), (0, 0)))
        x2p = x2_2d.reshape(Rp, P * N)        # free reshape (contiguous)

    # ---- tiling: big tiles amortize step overhead; even #tiles for 2 TCs ----
    MIN_SPLIT = 1024                          # packed rows before splitting pays
    n_tiles = pl.cdiv(Rp, block_rows)
    if Rp >= 2 * MIN_SPLIT:
        n_tiles = max(n_tiles, 2)             # keep both v7x TensorCores busy
    if n_tiles > 1 and n_tiles % 2:
        n_tiles += 1
    rt = Rp if n_tiles == 1 else _round_up(pl.cdiv(Rp, n_tiles), 8)
    grid_m = pl.cdiv(Rp, rt)
    Rp_pad = grid_m * rt
    if Rp_pad != Rp:                          # < 8 packed rows per tile of pad
        x1p = jnp.pad(x1p, ((0, Rp_pad - Rp), (0, 0)))
        if not fold_x2:
            x2p = jnp.pad(x2p, ((0, Rp_pad - Rp), (0, 0)))

    # ---- VMEM budget: double-buffered, lane-padded-to-128 stream tiles ------
    n_streams = 2 if fold_x2 else 3           # x1 (+ x2) + out
    vmem_need = n_streams * 2 * rt * 128 * 4 + 2 * (P * K + 8) * 128 * 4
    vmem_limit = min(max(int(1.5 * vmem_need), 32 * 1024 * 1024),
                     64 * 1024 * 1024)
    compiler_params = pltpu.CompilerParams(
        dimension_semantics=("parallel",),
        vmem_limit_bytes=vmem_limit,
    )

    const_specs = [
        pl.BlockSpec((P * K, P * N), lambda i: (0, 0)),   # kron(I_P, w)
        pl.BlockSpec((1, P * N), lambda i: (0, 0)),       # bias row
    ]
    x1_spec = pl.BlockSpec((rt, P * K), lambda i: (i, 0))
    row_spec = pl.BlockSpec((rt, P * N), lambda i: (i, 0))

    if fold_x2:
        kernel = _linear_relu_kernel
        in_specs = const_specs + [x1_spec]
        operands = (bmat, bias_row, x1p)
    else:
        kernel = _linear_add_relu_kernel
        in_specs = const_specs + [x1_spec, row_spec]
        operands = (bmat, bias_row, x1p, x2p)

    out_packed = pl.pallas_call(
        kernel,
        out_shape=jax.ShapeDtypeStruct((Rp_pad, P * N), out_dtype),
        grid=(grid_m,),
        in_specs=in_specs,
        out_specs=row_spec,
        compiler_params=compiler_params,
    )(*operands)

    # Padded packed rows / padded logical rows compute relu(bias) garbage and
    # are sliced off here (keep these slices if the padding strategy changes).
    out = out_packed[:Rp].reshape(Mp, N)[:M].reshape(*lead, N)
    return out


if __name__ == "__main__":
    key = jax.random.PRNGKey(0)
    kw, kb, kx1, kx2, kx2b = jax.random.split(key, 5)

    K_IN, N_OUT = 3, 8
    B, S = 2, 64                      # 128 rows -> 8 packed 128-lane rows

    # Quantize inputs to bf16-representable values so the in-kernel MXU
    # contraction and the pure-VPU reference agree to f32 rounding regardless
    # of the MXU pass count used for f32 matmuls.
    def q(x):
        return x.astype(jnp.bfloat16).astype(jnp.float32)

    bound = 1.0 / math.sqrt(K_IN)     # mimic nn.Linear's init range
    w = q(jax.random.uniform(kw, (K_IN, N_OUT), jnp.float32, -bound, bound))
    b = q(jax.random.uniform(kb, (N_OUT,), jnp.float32, -bound, bound))
    x1 = q(jax.random.normal(kx1, (B, S, K_IN), jnp.float32))
    x2 = q(jax.random.normal(kx2, (B, S, N_OUT), jnp.float32))    # dense add
    x2b = q(jax.random.normal(kx2b, (1, 1, N_OUT), jnp.float32))  # broadcast add

    def reference(x1_, x2_):
        o1 = (x1_[..., :, None] * w[None, None]).sum(axis=-2) + b  # exact f32
        return jnp.maximum(o1 + x2_, 0.0)

    # Dense-x2 path.
    out = jax.block_until_ready(linear_add_relu(x1, x2, w, b))
    assert out.shape == (B, S, N_OUT)
    assert jnp.allclose(out, reference(x1, x2), atol=1e-5, rtol=1e-5)

    # Broadcast-x2 path (x2 folded into the bias, no x2 stream).
    out_b = jax.block_until_ready(linear_add_relu(x1, x2b, w, b))
    assert out_b.shape == (B, S, N_OUT)
    assert jnp.allclose(out_b, reference(x1, x2b), atol=1e-5, rtol=1e-5)

    print("KERNEL_OK")
</pallas_src>

<mosaic_0001>
module attributes {stable_mosaic.version = 11 : i64} {
  func.func @_linear_add_relu_kernel(%arg0: i32, %arg1: memref<48x128xf32, #tpu.memory_space<vmem>>, %arg2: memref<1x128xf32, #tpu.memory_space<vmem>>, %arg3: memref<8x48xf32, #tpu.memory_space<vmem>>, %arg4: memref<8x128xf32, #tpu.memory_space<vmem>>, %arg5: memref<8x128xf32, #tpu.memory_space<vmem>>) attributes {dimension_semantics = [#tpu.dimension_semantics<parallel>], iteration_bounds = array<i64: 1>, scalar_prefetch = 0 : i64, scratch_operands = 0 : i64, tpu.core_type = #tpu.core_type<tc>, window_params = [{pipeline_mode = #tpu.pipeline_mode<synchronous>, transform_indices = @transform_0, window_bounds = array<i64: 48, 128>}, {pipeline_mode = #tpu.pipeline_mode<synchronous>, transform_indices = @transform_1, window_bounds = array<i64: 1, 128>}, {transform_indices = @transform_2, window_bounds = array<i64: 8, 48>}, {transform_indices = @transform_3, window_bounds = array<i64: 8, 128>}, {transform_indices = @transform_4, window_bounds = array<i64: 8, 128>}]} {
    %c0 = arith.constant 0 : index
    %c0_0 = arith.constant 0 : index
    %0 = vector.load %arg3[%c0, %c0_0] : memref<8x48xf32, #tpu.memory_space<vmem>>, vector<8x48xf32>
    %c0_1 = arith.constant 0 : index
    %c0_2 = arith.constant 0 : index
    %1 = vector.load %arg1[%c0_1, %c0_2] : memref<48x128xf32, #tpu.memory_space<vmem>>, vector<48x128xf32>
    %cst = arith.constant dense<0.000000e+00> : vector<8x128xf32>
    %2 = tpu.matmul %0, %1, %cst {dimension_numbers = #tpu.dot_dimension_numbers<[1], [0], [0], [1], [0, 0, 1, 1], [], []>} : vector<8x48xf32>, vector<48x128xf32>, vector<8x128xf32> -> vector<8x128xf32>
    %c0_3 = arith.constant 0 : index
    %c0_4 = arith.constant 0 : index
    %3 = vector.load %arg2[%c0_3, %c0_4] : memref<1x128xf32, #tpu.memory_space<vmem>>, vector<1x128xf32>
    %4 = vector.broadcast %3 : vector<1x128xf32> to vector<8x128xf32>
    %5 = arith.addf %2, %4 : vector<8x128xf32>
    %c0_5 = arith.constant 0 : index
    %c0_6 = arith.constant 0 : index
    %6 = vector.load %arg4[%c0_5, %c0_6] : memref<8x128xf32, #tpu.memory_space<vmem>>, vector<8x128xf32>
    %7 = arith.addf %5, %6 : vector<8x128xf32>
    %cst_7 = arith.constant 0.000000e+00 : f32
    %8 = vector.broadcast %cst_7 : f32 to vector<8x128xf32>
    %9 = arith.maximumf %7, %8 : vector<8x128xf32>
    %c0_8 = arith.constant 0 : index
    %c0_9 = arith.constant 0 : index
    %10 = vector.load %arg5[%c0_8, %c0_9] : memref<8x128xf32, #tpu.memory_space<vmem>>, vector<8x128xf32>
    tpu.vector_store %arg5[%c0_8, %c0_9], %9 {strides = array<i32>} : memref<8x128xf32, #tpu.memory_space<vmem>>, vector<8x128xf32>,
    return
  }
  func.func @transform_0(%arg0: i32) -> (i32, i32) {
    %c0_i32 = arith.constant 0 : i32
    %c0_i32_0 = arith.constant 0 : i32
    %c0_i32_1 = arith.constant 0 : i32
    return %c0_i32, %c0_i32_0 : i32, i32
  }
  func.func @transform_1(%arg0: i32) -> (i32, i32) {
    %c0_i32 = arith.constant 0 : i32
    %c0_i32_0 = arith.constant 0 : i32
    %c0_i32_1 = arith.constant 0 : i32
    return %c0_i32, %c0_i32_0 : i32, i32
  }
  func.func @transform_2(%arg0: i32) -> (i32, i32) {
    %c0_i32 = arith.constant 0 : i32
    %c0_i32_0 = arith.constant 0 : i32
    return %arg0, %c0_i32 : i32, i32
  }
  func.func @transform_3(%arg0: i32) -> (i32, i32) {
    %c0_i32 = arith.constant 0 : i32
    %c0_i32_0 = arith.constant 0 : i32
    return %arg0, %c0_i32 : i32, i32
  }
  func.func @transform_4(%arg0: i32) -> (i32, i32) {
    %c0_i32 = arith.constant 0 : i32
    %c0_i32_0 = arith.constant 0 : i32
    return %arg0, %c0_i32 : i32, i32
  }
}

</mosaic_0001>

<bundles_post_ra>
// kernel: tpu_custom_call.1
= control target key start
LH: loop header
LB: loop body
LE: loop exit
PB: predicated region body
PF: predicated region fallthrough
CT: control target
= control target key end

     0   :  { %9 = vsyncpa [#allocation3], 0  ;;  %s317_s0 = inlined_call_operand.hbm [shape: f32[48,128], index: 0, kind: input, shape index: {}]   ;;  %s318_s1 = inlined_call_operand.hbm [shape: f32[1,128], index: 1, kind: input, shape index: {}]   ;;  %s319_s2 = inlined_call_operand.hbm [shape: f32[8,48], index: 2, kind: input, shape index: {}]   ;;  %s320_s3 = inlined_call_operand.hbm [shape: f32[8,128], index: 3, kind: input, shape index: {}]   ;;  %s321_s4 = inlined_call_operand.hbm [shape: f32[8,128], index: 4, kind: output, shape index: {}]  }
   0x1   :  { %10 = vsyncpa [#allocation6], 0 }
   0x2   :  { %11 = vsyncpa [#allocation9], 0  ;;  %s31_s17 = sshll.u32 %s318_s1, 4  ;;  %s32_s17 = int_to_ptr.hbm [resolvable:$true] %s31_s17 }
   0x3   :  { %12 = vsyncpa [#allocation4], 0  ;;  %s270_s18 = smov [#allocation5]   ;;  %s17_s22 = sshll.u32 %s317_s0, 4  ;;  %s18_s22 = int_to_ptr.hbm [resolvable:$true] %s17_s22 }
   0x4   :  { %s33_s19 = sshll.u32 %s270_s18, 4  ;;  %s271_s23 = smov [#allocation2]   ;;  %s34_s19 = int_to_ptr.vmem [resolvable:$true] %s33_s19 }
   0x5   :  { %36 = dma.hbm_to_vmem [thread:$0]  %s32_s17, 16, %s34_s19, [#allocation6]  }
   0x6   :  { %s19_s24 = sshll.u32 %s271_s23, 4  ;;  %s272_s25 = smov 128   ;;  %s20_s24 = int_to_ptr.vmem [resolvable:$true] %s19_s24 }
   0x7   :  { %s273_s26 = smov 8   ;;  %s42_s1 = sshll.u32 %s319_s2, 4  ;;  %s43_s1 = int_to_ptr.hbm [resolvable:$true] %s42_s1 }
   0x8   :  { %25 = dma.hbm_to_vmem [thread:$0]  %s18_s22, 768, %s20_s24, [#allocation3], %s272_s25, %s272_s25, %s273_s26  }
   0x9   :  { %s274_s29 = smov [#allocation7]   ;;  %s53_s0 = sshll.u32 %s320_s3, 4  ;;  %s54_s0 = int_to_ptr.hbm [resolvable:$true] %s53_s0 }
   0xa   :  { %s44_s30 = sshll.u32 %s274_s29, 4  ;;  %s275_s7 = smov [#allocation8]   ;;  %s45_s30 = int_to_ptr.vmem [resolvable:$true] %s44_s30 }
   0xb   :  { %47 = dma.hbm_to_vmem [thread:$0]  %s43_s1, 128, %s45_s30, [#allocation6]  }
   0xc   :  { %s55_s8 = sshll.u32 %s275_s7, 4  ;;  %s56_s8 = int_to_ptr.vmem [resolvable:$true] %s55_s8 }
   0xd   :  { %58 = dma.hbm_to_vmem [thread:$0]  %s54_s0, 128, %s56_s8, [#allocation9]  }
   0xe   :  { %262 = dma.done.wait [#allocation3], 768  }
   0xf   :  { %263 = vsyncadd [#allocation3], 4294966528 }
  0x10   :  { %264 = dma.done.wait [#allocation6], 144  }
  0x11   :  { %265 = vsyncadd [#allocation6], 4294967152 }
  0x12   :  { %266 = dma.done.wait [#allocation9], 128  }
  0x13   :  { %267 = vsyncadd [#allocation9], 4294967168  ;;  %v81_v0 = vld [vmem:[#allocation2 + $0x28] sm:$0xff]  ;;  %v80_v1 = vld [vmem:[#allocation2 + $0x20] sm:$0xff]  ;;  %vm86_vm0 = vcmask 392192   ;;  %s276_s2 = smov [#allocation10]  }
  0x14   :  { %100 = vmatpush.msra.mxu0 %v81_v0  ;;  %v79_v2 = vld [vmem:[#allocation2 + $0x18] sm:$0xff]  ;;  %v78_v3 = vld [vmem:[#allocation2 + $0x10] sm:$0xff]  ;;  %v77_v4 = vld [vmem:[#allocation2 + $0x8] sm:$0xff]  ;;  %s119_s3 = sshll.u32 %s276_s2, 4  ;;  %s121_s11 = sshll.u32 %s321_s4, 4  ;;  %s120_s3 = int_to_ptr.vmem [resolvable:$true] %s119_s3  ;;  %s122_s11 = int_to_ptr.hbm [resolvable:$true] %s121_s11 }
  0x15   :  { %v76_v5 = vld [vmem:[#allocation2] sm:$0xff]  ;;  %v75_v6 = vld [vmem:[#allocation7] sm:$0xff]  ;;  %v141_v7 = vld [vmem:[#allocation5] ss:$0 sm:$0xff] }
  0x16   :  { %101 = vmatpush.msra.mxu0 %v80_v1  ;;  %v110_v9 = vld [vmem:[#allocation8] sm:$0xff] }
  0x18   :  { %102 = vmatpush.msra.mxu0 %v79_v2 }
  0x1a   :  { %103 = vmatpush.msra.mxu0 %v78_v3 }
  0x1c   :  { %104 = vmatpush.msra.mxu0 %v77_v4 }
  0x1e   :  { %105 = vmatpush.msra.mxu0 %v76_v5 }
  0x1f   :  { %133 = vmatmul.msk.f32.vlgmr.msra.gmra.mxu0 %vm86_vm0, %v75_v6 }
  0x9c   :  { %v107_v8 = vpop.f32.mrf.mxu0 }
  0x9d   :  { %v108_v10 = vadd.f32 %v141_v7, %v107_v8 }
  0x9f   :  { %v111_v11 = vadd.f32 %v110_v9, %v108_v10 }
  0xa1   :  { %v112_v12 = vmax.f32 %v111_v11, 0.0 }
  0xa3   :  { %113 = vst [vmem:[#allocation10] sm:$0xff] %v112_v12 }
  0xa4   :  { %124 = dma.vmem_to_hbm [thread:$0]  %s120_s3, 128, %s122_s11, [#allocation4]  }
  0xa5   :  { %268 = dma.done.wait [#allocation4], 128  }
  0xa6   :  { %269 = vsyncadd [#allocation4], 4294967168 }
  0xa7   :  { %129 = vsyncpa [#allocation3], 1 }
  0xa8   :  { %130 = vsyncpa [#allocation6], 1 }
  0xa9   :  { %131 = vsyncpa [#allocation9], 1 }
  0xaa   :  { %132 = vsyncpa [#allocation4], 1 }

</bundles_post_ra>
